<compile_context>
chip_gen: v7x
topology: tpu7x:2x2x1
jax: 0.10.0
libtpu: 0.0.40
codegen_flags: <defaults>
</compile_context>

<pallas_src>
import functools

import jax
import jax.numpy as jnp
from jax.experimental import pallas as pl
from jax.experimental.pallas import tpu as pltpu


def _ce2d_kernel(pred_ref, tgt_ref, out_ref, *, num_classes, ignore_label):
    """One (batch, chunk, spatial-tile) grid step.

    pred_ref: (1, C, S) logits in input dtype, lane-dense spatial axis.
    tgt_ref:  (1, 1, S) int32 labels (ragged tail / overhang carries -1).
    out_ref:  (1, 1, 2, S) f32 resident accumulator:
              row 0 = per-lane loss partial sums, row 1 = per-lane valid counts.
    """
    s = pl.program_id(2)

    @pl.when(s == 0)
    def _():
        out_ref[...] = jnp.zeros_like(out_ref)

    logits = pred_ref[0].astype(jnp.float32)          # (C, S), f32 in-register
    tgt = tgt_ref[0]                                  # (1, S) int32

    # Validity: 0 <= tgt < C (and != ignore_label only when it is an in-range
    # class).  Padded / out-of-image lanes carry -1, so no iota tail mask.
    valid = jnp.logical_and(tgt >= 0, tgt < num_classes)
    if 0 <= ignore_label < num_classes:
        valid = jnp.logical_and(valid, tgt != ignore_label)

    # Numerically stable logsumexp over the (small) class / sublane axis.
    m = jnp.max(logits, axis=0, keepdims=True)                            # (1,S)
    lse = m + jnp.log(jnp.sum(jnp.exp(logits - m), axis=0, keepdims=True))

    # Logit at the target class via compare+select+sum along the class axis
    # (cheaper than a sublane gather or an MXU one-hot matmul for small C).
    cls = jax.lax.broadcasted_iota(jnp.int32, logits.shape, 0)            # (C,S)
    picked = jnp.sum(jnp.where(cls == tgt, logits, 0.0), axis=0, keepdims=True)

    # Selects (not multiplies): garbage lanes (NaN/Inf) never reach the acc.
    loss = jnp.where(valid, lse - picked, 0.0)                            # (1,S)
    cnt = valid.astype(jnp.float32)                                       # (1,S)

    out_ref[0, 0] += jnp.concatenate([loss, cnt], axis=0)                 # (2,S)


def cross_entropy_2d(predict, target, *, ignore_label=255, reduction='mean',
                     vmem_budget_bytes=16 * 1024 * 1024, max_s_tile=32768):
    """predict: (n, c, h, w) float; target: (n, 1, h, w) integer labels."""
    n, c, h, w = predict.shape
    assert target.shape == (n, 1, h, w), (predict.shape, target.shape)
    hw = h * w

    # Free, contiguous reshapes; logits keep their HBM dtype.
    pred = predict.reshape(n, c, hw)
    tgt = target.reshape(n, 1, hw).astype(jnp.int32)

    if hw < 128:
        # Tiny spatial extent: pad both to one 128-lane tile (negligible cost).
        pred = jnp.pad(pred, ((0, 0), (0, 0), (0, 128 - hw)))
        tgt = jnp.pad(tgt, ((0, 0), (0, 0), (0, 128 - hw)), constant_values=-1)
        hw_arr = 128
    else:
        hw_arr = hw

    # Adaptive lane-dense spatial tile: largest tile whose double-buffered
    # logits block fits the conservative VMEM budget, capped at max_s_tile and
    # at the 128-floored spatial extent; always a multiple of 128.
    dbytes = jnp.dtype(predict.dtype).itemsize
    s_from_vmem = vmem_budget_bytes // (2 * c * dbytes)
    s_tile = min(max_s_tile, s_from_vmem, (hw_arr // 128) * 128)
    s_tile = max(128, (s_tile // 128) * 128)

    num_blocks = pl.cdiv(hw_arr, s_tile)
    # Split the spatial block range into 2 chunks so v7x's two TensorCores get
    # work even when n == 1; harmless on single-core v5e/v6e.
    p_split = 2 if num_blocks >= 2 else 1
    num_s = pl.cdiv(num_blocks, p_split)
    grid_cover = p_split * num_s * s_tile

    # Pad only the (tiny) label plane to full grid coverage with an
    # always-invalid label; ragged tails / overhang blocks then need no
    # in-kernel masking and logits are never padded in HBM.
    if grid_cover > hw_arr:
        tgt = jnp.pad(tgt, ((0, 0), (0, 0), (0, grid_cover - hw_arr)),
                      constant_values=-1)

    last_blk = num_blocks - 1

    def pred_map(b, p, s):
        # Clamp so overhang grid steps re-read the last real block (their
        # labels are all invalid, so duplicated logits contribute nothing).
        return (b, 0, jnp.minimum(p * num_s + s, last_blk))

    def tgt_map(b, p, s):
        return (b, 0, p * num_s + s)

    def out_map(b, p, s):
        return (b, p, 0, 0)

    kernel = functools.partial(_ce2d_kernel, num_classes=c,
                               ignore_label=ignore_label)

    partials = pl.pallas_call(
        kernel,
        out_shape=jax.ShapeDtypeStruct((n, p_split, 2, s_tile), jnp.float32),
        grid_spec=pltpu.PrefetchScalarGridSpec(
            num_scalar_prefetch=0,
            grid=(n, p_split, num_s),
            in_specs=[
                pl.BlockSpec((1, c, s_tile), pred_map),
                pl.BlockSpec((1, 1, s_tile), tgt_map),
            ],
            out_specs=pl.BlockSpec((1, 1, 2, s_tile), out_map),
        ),
        compiler_params=pltpu.CompilerParams(
            dimension_semantics=("parallel", "parallel", "arbitrary"),
            vmem_limit_bytes=32 * 1024 * 1024),
    )(pred, tgt)

    # Single tiny trailing reduction: row 0 = loss sum, row 1 = valid count.
    totals = jnp.sum(partials, axis=(0, 1, 3))
    loss_sum, valid_cnt = totals[0], totals[1]

    # TODO(synk): optional per-class `weights` rescaling (module default is None).
    if reduction == 'mean':
        return loss_sum / valid_cnt       # NaN if no valid pixel, like torch
    elif reduction == 'sum':
        return loss_sum
    else:
        # TODO(synk): reduction='none' returns a data-dependent-length vector of
        # per-valid-pixel losses; not expressible as a fixed-shape kernel output.
        raise NotImplementedError("reduction='none' not supported")


def _reference(predict, target, ignore_label=255):
    n, c, h, w = predict.shape
    tgt = target.reshape(n, h, w).astype(jnp.int32)
    logits = jnp.transpose(predict, (0, 2, 3, 1)).astype(jnp.float32)
    valid = jnp.logical_and(jnp.logical_and(tgt >= 0, tgt < c),
                            tgt != ignore_label)
    m = jnp.max(logits, axis=-1)
    lse = m + jnp.log(jnp.sum(jnp.exp(logits - m[..., None]), axis=-1))
    safe_tgt = jnp.where(valid, tgt, 0)
    picked = jnp.take_along_axis(logits, safe_tgt[..., None], axis=-1)[..., 0]
    loss = jnp.where(valid, lse - picked, 0.0)
    return jnp.sum(loss) / jnp.sum(valid.astype(jnp.float32))


if __name__ == "__main__":
    key = jax.random.PRNGKey(0)
    k1, k2, k3, k4, k5, k6 = jax.random.split(key, 6)

    # Test 1: lane-aligned spatial size (h*w = 256), single spatial block.
    n, c, h, w = 2, 4, 16, 16
    predict = jax.random.normal(k1, (n, c, h, w), dtype=jnp.float32)
    target = jax.random.randint(k2, (n, 1, h, w), 0, c, dtype=jnp.int32)
    ignore_mask = jax.random.bernoulli(k3, 0.2, (n, 1, h, w))
    target = jnp.where(ignore_mask, 255, target)

    loss = cross_entropy_2d(predict, target, ignore_label=255, reduction='mean')
    loss = jax.block_until_ready(loss)
    ref = _reference(predict, target, ignore_label=255)
    assert jnp.allclose(loss, ref, rtol=1e-5, atol=1e-5), (loss, ref)

    # Test 2: ragged spatial size (h*w = 300) -> exercises the 2-chunk parallel
    # split, the partial edge block, and the invalid-label tail padding.
    n2, c2, h2, w2 = 2, 5, 12, 25
    predict2 = jax.random.normal(k4, (n2, c2, h2, w2), dtype=jnp.float32)
    target2 = jax.random.randint(k5, (n2, 1, h2, w2), 0, c2, dtype=jnp.int32)
    ignore_mask2 = jax.random.bernoulli(k6, 0.2, (n2, 1, h2, w2))
    target2 = jnp.where(ignore_mask2, 255, target2)

    loss2 = cross_entropy_2d(predict2, target2, ignore_label=255,
                             reduction='mean')
    loss2 = jax.block_until_ready(loss2)
    ref2 = _reference(predict2, target2, ignore_label=255)
    assert jnp.allclose(loss2, ref2, rtol=1e-5, atol=1e-5), (loss2, ref2)

    print("KERNEL_OK")
</pallas_src>

<mosaic_0001>
module attributes {stable_mosaic.version = 11 : i64} {
  func.func @_ce2d_kernel(%arg0: i32, %arg1: i32, %arg2: i32, %arg3: memref<1x4x256xf32, #tpu.memory_space<vmem>>, %arg4: memref<1x1x256xi32, #tpu.memory_space<vmem>>, %arg5: memref<1x1x2x256xf32, #tpu.memory_space<vmem>>) attributes {dimension_semantics = [#tpu.dimension_semantics<parallel>, #tpu.dimension_semantics<parallel>, #tpu.dimension_semantics<arbitrary>], iteration_bounds = array<i64: 2, 1, 1>, scalar_prefetch = 0 : i64, scratch_operands = 0 : i64, tpu.core_type = #tpu.core_type<tc>, window_params = [{transform_indices = @transform_0, window_bounds = array<i64: 1, 4, 256>}, {transform_indices = @transform_1, window_bounds = array<i64: 1, 1, 256>}, {transform_indices = @transform_2, window_bounds = array<i64: 1, 1, 2, 256>}]} {
    %c0_i32 = arith.constant 0 : i32
    %0 = arith.cmpi eq, %arg2, %c0_i32 : i32
    %1 = arith.extui %0 : i1 to i32
    %c0_i32_0 = arith.constant 0 : i32
    %2 = arith.cmpi ne, %1, %c0_i32_0 : i32
    scf.if %2 {
      %cst_19 = arith.constant 0.000000e+00 : f32
      %40 = vector.broadcast %cst_19 : f32 to vector<1x1x2x256xf32>
      %c0_20 = arith.constant 0 : index
      %c0_21 = arith.constant 0 : index
      %c0_22 = arith.constant 0 : index
      %c0_23 = arith.constant 0 : index
      %41 = vector.load %arg5[%c0_20, %c0_21, %c0_22, %c0_23] : memref<1x1x2x256xf32, #tpu.memory_space<vmem>>, vector<1x1x2x256xf32>
      tpu.vector_store %arg5[%c0_20, %c0_21, %c0_22, %c0_23], %40 {strides = array<i32>} : memref<1x1x2x256xf32, #tpu.memory_space<vmem>>, vector<1x1x2x256xf32>,
    } else {
    }
    %c0 = arith.constant 0 : index
    %c0_1 = arith.constant 0 : index
    %c0_2 = arith.constant 0 : index
    %3 = vector.load %arg3[%c0, %c0_1, %c0_2] : memref<1x4x256xf32, #tpu.memory_space<vmem>>, vector<1x4x256xf32>
    %4 = vector.shape_cast %3 : vector<1x4x256xf32> to vector<4x256xf32>
    %c0_3 = arith.constant 0 : index
    %c0_4 = arith.constant 0 : index
    %c0_5 = arith.constant 0 : index
    %5 = vector.load %arg4[%c0_3, %c0_4, %c0_5] : memref<1x1x256xi32, #tpu.memory_space<vmem>>, vector<1x1x256xi32>
    %6 = vector.shape_cast %5 : vector<1x1x256xi32> to vector<1x256xi32>
    %c0_i32_6 = arith.constant 0 : i32
    %7 = vector.broadcast %c0_i32_6 : i32 to vector<1x256xi32>
    %8 = arith.cmpi sge, %6, %7 : vector<1x256xi32>
    %c4_i32 = arith.constant 4 : i32
    %9 = vector.broadcast %c4_i32 : i32 to vector<1x256xi32>
    %10 = arith.cmpi slt, %6, %9 : vector<1x256xi32>
    %11 = arith.andi %8, %10 : vector<1x256xi1>
    %cst = arith.constant dense<0xFF800000> : vector<256xf32>
    %12 = vector.multi_reduction <maximumf>, %4, %cst [0] : vector<4x256xf32> to vector<256xf32>
    %13 = vector.shape_cast %12 : vector<256xf32> to vector<1x256xf32>
    %14 = vector.broadcast %13 : vector<1x256xf32> to vector<4x256xf32>
    %15 = arith.subf %4, %14 : vector<4x256xf32>
    %16 = math.exp %15 : vector<4x256xf32>
    %cst_7 = arith.constant dense<0.000000e+00> : vector<256xf32>
    %17 = vector.multi_reduction <add>, %16, %cst_7 [0] : vector<4x256xf32> to vector<256xf32>
    %18 = vector.shape_cast %17 : vector<256xf32> to vector<1x256xf32>
    %19 = math.log %18 : vector<1x256xf32>
    %20 = arith.addf %13, %19 : vector<1x256xf32>
    %21 = tpu.iota {dimensions = array<i32: 0>} : vector<4x256xi32>
    %22 = vector.broadcast %6 : vector<1x256xi32> to vector<4x256xi32>
    %23 = arith.cmpi eq, %21, %22 : vector<4x256xi32>
    %cst_8 = arith.constant 0.000000e+00 : f32
    %24 = vector.broadcast %cst_8 : f32 to vector<4x256xf32>
    %25 = arith.select %23, %4, %24 : vector<4x256xi1>, vector<4x256xf32>
    %cst_9 = arith.constant dense<0.000000e+00> : vector<256xf32>
    %26 = vector.multi_reduction <add>, %25, %cst_9 [0] : vector<4x256xf32> to vector<256xf32>
    %27 = vector.shape_cast %26 : vector<256xf32> to vector<1x256xf32>
    %28 = arith.subf %20, %27 : vector<1x256xf32>
    %cst_10 = arith.constant 0.000000e+00 : f32
    %29 = vector.broadcast %cst_10 : f32 to vector<1x256xf32>
    %30 = arith.select %11, %28, %29 : vector<1x256xi1>, vector<1x256xf32>
    %31 = arith.extui %11 : vector<1x256xi1> to vector<1x256xi32>
    %32 = arith.sitofp %31 : vector<1x256xi32> to vector<1x256xf32>
    %c0_11 = arith.constant 0 : index
    %c0_12 = arith.constant 0 : index
    %c0_13 = arith.constant 0 : index
    %c0_14 = arith.constant 0 : index
    %33 = vector.load %arg5[%c0_11, %c0_12, %c0_13, %c0_14] : memref<1x1x2x256xf32, #tpu.memory_space<vmem>>, vector<1x1x2x256xf32>
    %34 = vector.shape_cast %33 : vector<1x1x2x256xf32> to vector<2x256xf32>
    %35 = tpu.concatenate %30, %32 in 0 : vector<1x256xf32>, vector<1x256xf32> -> vector<2x256xf32>
    %36 = arith.addf %34, %35 : vector<2x256xf32>
    %c0_15 = arith.constant 0 : index
    %c0_16 = arith.constant 0 : index
    %c0_17 = arith.constant 0 : index
    %c0_18 = arith.constant 0 : index
    %37 = vector.load %arg5[%c0_15, %c0_16, %c0_17, %c0_18] : memref<1x1x2x256xf32, #tpu.memory_space<vmem>>, vector<1x1x2x256xf32>
    %38 = vector.shape_cast %37 : vector<1x1x2x256xf32> to vector<2x256xf32>
    %39 = vector.shape_cast %36 : vector<2x256xf32> to vector<1x1x2x256xf32>
    tpu.vector_store %arg5[%c0_15, %c0_16, %c0_17, %c0_18], %39 {strides = array<i32>} : memref<1x1x2x256xf32, #tpu.memory_space<vmem>>, vector<1x1x2x256xf32>,
    return
  }
  func.func @transform_0(%arg0: i32, %arg1: i32, %arg2: i32) -> (i32, i32, i32) {
    %c1_i32 = arith.constant 1 : i32
    %0 = arith.muli %arg1, %c1_i32 : i32
    %1 = arith.addi %0, %arg2 : i32
    %c0_i32 = arith.constant 0 : i32
    %2 = arith.minsi %1, %c0_i32 : i32
    %c0_i32_0 = arith.constant 0 : i32
    %c0_i32_1 = arith.constant 0 : i32
    return %arg0, %c0_i32_0, %2 : i32, i32, i32
  }
  func.func @transform_1(%arg0: i32, %arg1: i32, %arg2: i32) -> (i32, i32, i32) {
    %c1_i32 = arith.constant 1 : i32
    %0 = arith.muli %arg1, %c1_i32 : i32
    %1 = arith.addi %0, %arg2 : i32
    %c0_i32 = arith.constant 0 : i32
    %c0_i32_0 = arith.constant 0 : i32
    return %arg0, %c0_i32, %1 : i32, i32, i32
  }
  func.func @transform_2(%arg0: i32, %arg1: i32, %arg2: i32) -> (i32, i32, i32, i32) {
    %c0_i32 = arith.constant 0 : i32
    %c0_i32_0 = arith.constant 0 : i32
    %c0_i32_1 = arith.constant 0 : i32
    return %arg0, %arg1, %c0_i32, %c0_i32_0 : i32, i32, i32, i32
  }
}

</mosaic_0001>

<bundles_post_ra>
// kernel: tpu_custom_call.1
= control target key start
LH: loop header
LB: loop body
LE: loop exit
PB: predicated region body
PF: predicated region fallthrough
CT: control target
= control target key end

     0   :  { %7 = vsyncpa [#allocation3], 0  ;;  %s1041_s0 = inlined_call_operand.hbm [shape: f32[2,4,256], index: 0, kind: input, shape index: {}]   ;;  %s1042_s1 = inlined_call_operand.hbm [shape: s32[2,1,256], index: 1, kind: input, shape index: {}]   ;;  %s1043_s2 = inlined_call_operand.hbm [shape: f32[2,1,2,256], index: 2, kind: output, shape index: {}]  }
   0x1   :  { %9 = vsyncpa [#allocation3 + $0x1], 0 }
   0x2   :  { %10 = vsyncpa [#allocation6], 0 }
   0x3   :  { %12 = vsyncpa [#allocation6 + $0x1], 0 }
   0x4   :  { %13 = vsyncpa [#allocation4], 0 }
   0x5   :  { %15 = vsyncpa [#allocation4 + $0x1], 0  ;;  %s793_s9 = smov 0   ;;  %s795_s10 = smov 0  }
   0x6   :  { %s797_s11 = smov 0   ;;  %s799_s12 = smov 0  }
   0x7   :  { %s801_s13 = smov 0   ;;  %s803_s14 = smov 0  }
   0x8 LB: > { %s524_s15 = sadd.s32 4294967295, %s770_s14   ;;  %s525_s16 = sadd.s32 4294967294, %s770_s14   ;;  %s770_s14 = sphi %s803_s14, %s21_s14   ;;  %s766_s13 = sphi %s801_s13, %s1063_s13   ;;  %s762_s12 = sphi %s799_s12, %s1062_s12   ;;  %s758_s11 = sphi %s797_s11, %s1061_s11   ;;  %s754_s10 = sphi %s795_s10, %s1060_s10   ;;  %s750_s9 = sphi %s793_s9, %s1059_s9  }
   0x9   : > { %s40_s17 = sadd.s32 1, %s766_s13  ;;  %s55_s18 = sadd.s32 1, %s758_s11 }
   0xa   : > { %p42_p0 = scmp.ge.s32.totalorder %s40_s17, 2  ;;  %p62_p1 = scmp.ne.s32.totalorder %s758_s11, %s754_s10 }
   0xb   : > { %p63_p2 = scmp.eq.s32.totalorder %s770_s14, 0  ;;  %p68_p3 = scmp.ne.s32.totalorder %s754_s10, %s750_s9 }
   0xc   : > { %s1065_s17 = smov (%p42_p0, %s40_s17), 0  ;;  %p69_p5 = scmp.eq.s32.totalorder %s524_s15, 0 }
   0xd   : > { %p834_p4 = por %p63_p2, %p62_p1  ;;  %s50_s20 = ssub.s32 %s766_s13, %s1065_s17 }
   0xe   : > { %p124_p6 = scmp.eq.s32.totalorder %s524_s15, 1  ;;  %p53_p7 = scmp.eq.s32.totalorder %s50_s20, 0 }
   0xf   : > { %p840_p8 = por %p69_p5, %p68_p3  ;;  %p130_p10 = scmp.eq.s32.totalorder %s525_s16, 1 }
  0x10   : > { %p844_p9 = por %p124_p6, %p62_p1  ;;  %p564_p13 = scmp.lt.s32.totalorder %s770_s14, 2 }
  0x11   : > { %s1047_s21 = scalar_select %p840_p8, 1, 0 }
  0x12   : > { %s1048_s22 = scalar_select %p844_p9, 1, 0 }
  0x13   : > { %s849_s23 = scalar_select %p53_p7, %s758_s11, %s55_s18  }
  0x14   : > { %p851_p11 = por %p130_p10, %p68_p3  ;;  %s858_s25 = sand.u32 1, %s758_s11  }
  0x15   : > { %s528_s26 = sshll.u32 %s858_s25, 3  ;;  %s544_s27 = sshll.u32 %s766_s13, 7 }
  0x16   : > { %s1049_s24 = scalar_select %p851_p11, 1, 0 }
  0x17   : > { %s865_s30 = scalar_lea.hbm %s1041_s0, %s544_s27  ;;  %s154_s3 = scalar_lea.vmem [#allocation2], %s528_s26 }
  0x18   : > { %s167_s4 = sshll.u32 %s154_s3, 4  ;;  %p871_p0 = pnand %p564_p13, %p834_p4  ;;  %s867_s4 = int_to_ptr.vmem [resolvable:$true] %s167_s4 }
  0x19   : > { %s151_s6 = scalar_lea.sflag [#allocation3], %s858_s25  ;;  %s624_s7 = scalar_lea.hbm %s865_s30, 128 }
  0x1a   : > { %p625_p3 = scmp.ne.s32.totalorder %s865_s30, %s624_s7  ;;  %p626_p5 = pneg %p871_p0 }
  0x1b   : > { %s629_s16 = scalar_lea.hbm %s1041_s0, 256  ;;  %p630_p4 = scmp.lt.u32.totalorder %s865_s30, %s1041_s0 }
  0x1c   : > { %p627_p6 = pnand %p626_p5, %p625_p3  ;;  %p631_p10 = scmp.lt.u32.totalorder %s629_s16, %s624_s7 }
  0x1d   : > { %p633_p12 = scmp.lt.u32.totalorder %s624_s7, %s865_s30 }
  0x1e   : > { %p628_p7 = pneg %p627_p6  ;;  %p632_p13 = por %p631_p10, %p630_p4 }
  0x20   : > { %p634_p1 = por %p633_p12, %p632_p13 }
  0x22   : > { %p635_p2 = pnand %p634_p1, %p628_p7 }
  0x24   : > { %638 = shalt.err (!%p635_p2)
}
  0x25   : > { %s639_s20 = scalar_lea.vmem %s867_s4, 128  ;;  %s772_s26 = smov [#allocation2]  }
  0x26   : > { %p640_p3 = scmp.ne.s32.totalorder %s867_s4, %s639_s20  ;;  %s644_s27 = sshll.u32 %s772_s26, 4  ;;  %s645_s27 = int_to_ptr.vmem [resolvable:$false] %s644_s27 }
  0x27   : > { %s646_s28 = scalar_lea.vmem %s645_s27, 256  ;;  %p647_p9 = scmp.lt.s32.totalorder %s867_s4, %s645_s27 }
  0x28   : > { %p642_p6 = pnand %p640_p3, %p626_p5  ;;  %p648_p4 = scmp.lt.s32.totalorder %s646_s28, %s639_s20 }
  0x2a   : > { %p643_p11 = pneg %p642_p6  ;;  %p649_p10 = por %p648_p4, %p647_p9 }
  0x2c   : > { %p650_p12 = pnand %p649_p10, %p643_p11 }
  0x2e   : > { %653 = shalt.err (!%p650_p12)
}
  0x2f   : > { %556 = dma.hbm_to_vmem [thread:$0]  (!%p871_p0), %s865_s30, 128, %s867_s4, %s151_s6  }
  0x30   : > { %p1051_p1 = scmp.lt.s32.totalorder %s770_s14, 3  ;;  %p1052_p2 = scmp.ge.s32.totalorder %s770_s14, 1 }
  0x31   : > { %s531_s3 = sshll.u32 %s858_s25, 1  ;;  %s545_s7 = sshll.u32 %s766_s13, 5 }
  0x32   : > { %p907_p7 = pnand %p1052_p2, %p1051_p1  ;;  %s916_s16 = scalar_lea.hbm %s1042_s1, %s545_s7 }
  0x33   : > { %s178_s18 = scalar_lea.vmem [#allocation5], %s531_s3  ;;  %s175_s30 = scalar_lea.sflag [#allocation6], %s858_s25 }
  0x34   : > { %s1053_s29 = scalar_select %p907_p7, 1, 0 }
  0x35   : > { %s189_s19 = sshll.u32 %s178_s18, 4  ;;  %s654_s4 = scalar_lea.hbm %s916_s16, 32  ;;  %s190_s19 = int_to_ptr.vmem [resolvable:$true] %s189_s19 }
  0x36   : > { %p655_p9 = scmp.ne.s32.totalorder %s916_s16, %s654_s4  ;;  %s659_s26 = scalar_lea.hbm %s1042_s1, 64 }
  0x37   : > { %p660_p3 = scmp.lt.u32.totalorder %s916_s16, %s1042_s1  ;;  %p661_p6 = scmp.lt.u32.totalorder %s659_s26, %s654_s4 }
  0x38   : > { %p657_p11 = pnand %p655_p9, %p626_p5  ;;  %p663_p10 = scmp.lt.u32.totalorder %s654_s4, %s916_s16 }
  0x39   : > { %p662_p4 = por %p661_p6, %p660_p3 }
  0x3a   : > { %p658_p13 = pneg %p657_p11 }
  0x3b   : > { %p664_p12 = por %p663_p10, %p662_p4 }
  0x3d   : > { %p665_p1 = pnand %p664_p12, %p658_p13 }
  0x3f   : > { %668 = shalt.err (!%p665_p1)
}
  0x40   : > { %s669_s25 = scalar_lea.vmem %s190_s19, 32  ;;  %s773_s3 = smov [#allocation5]  }
  0x41   : > { %p670_p2 = scmp.ne.s32.totalorder %s190_s19, %s669_s25  ;;  %s674_s7 = sshll.u32 %s773_s3, 4  ;;  %s675_s7 = int_to_ptr.vmem [resolvable:$false] %s674_s7 }
  0x42   : > { %s676_s8 = scalar_lea.vmem %s675_s7, 64  ;;  %p677_p8 = scmp.lt.s32.totalorder %s190_s19, %s675_s7 }
  0x43   : > { %p672_p9 = pnand %p670_p2, %p626_p5  ;;  %p678_p7 = scmp.lt.s32.totalorder %s676_s8, %s669_s25 }
  0x45   : > { %p673_p11 = pneg %p672_p9  ;;  %p679_p3 = por %p678_p7, %p677_p8 }
  0x47   : > { %p680_p6 = pnand %p679_p3, %p673_p11 }
  0x49   : > { %683 = shalt.err (!%p680_p6)
}
  0x4a   : > { %559 = dma.hbm_to_vmem [thread:$0]  (!%p871_p0), %s916_s16, 32, %s190_s19, %s175_s30  }
  0x4b   : > { %p1054_p13 = scmp.ne.s32.totalorder %s1053_s29, 0 }
  0x4c   : > { %s941_s15 = sand.u32 (!%p1054_p13), 1, %s754_s10   ;;  %p1055_p5 = scmp.ne.s32.totalorder (!%p1054_p13), %s1047_s21, 0 }
  0x4d   : > { %198 = sbr.rel (%p1054_p13) target bundleno = 183 (0xb7), region = 28  ;;  %s535_s18 = sshll.u32 (!%p1054_p13), %s941_s15, 3 }
  0x4e   : > { %s201_s4 = scalar_lea.sflag (!%p1054_p13), [#allocation3], %s941_s15  ;;  %s204_s6 = scalar_lea.vmem (!%p1054_p13), [#allocation2], %s535_s18 }
  0x54   : > { %737 = dma.done.wait (%p1055_p5), %s201_s4, 128  }
  0x55   : > { %739 = vsyncadd (%p1055_p5), %s201_s4, 4294967168  ;;  %s536_s5 = sshll.u32 %s941_s15, 1  ;;  %s210_s29 = scalar_lea.sflag [#allocation6], %s941_s15 }
  0x56   : > { %s213_s16 = scalar_lea.vmem [#allocation5], %s536_s5 }
  0x57   : > { %741 = dma.done.wait (%p1055_p5), %s210_s29, 32  }
  0x58   : > { %743 = vsyncadd (%p1055_p5), %s210_s29, 4294967264  ;;  %s537_s19 = sshll.u32 %s941_s15, 2  ;;  %v774_v0 = vmov 0.0   ;;  %vm258_vm0 = vcmask 1043456   ;;  %v250_v1 = vld [vmem:[%s204_s6] sm:$0xff]  ;;  %v303_v16 = vlaneseq  ;;  %vm377_vm6 = vcmask 1040384  }
  0x59   : > { %s956_s30 = scalar_lea.vmem [#allocation7], %s537_s19  ;;  %v256_v2 = vcombine.high %v250_v1, %v250_v1  ;;  %v259_v3 = vsel %vm258_vm0, %v250_v1, -inf  ;;  %v251_v23 = vld [vmem:[%s213_s16] sm:$0x3]  ;;  %v775_v57 = vmov 1966171168  }
  0x5a   : > { %249 = vst [vmem:[%s956_s30] sm:$0xf] %v774_v0  ;;  %v260_v4 = vrot.slane %v259_v3, 4  ;;  %v962_v19 = vshrl.u32 %v303_v16, 7  ;;  %v337_v58 = vunpack.c.l.s4 %v775_v57  ;;  %vm252_vm3 = vcmp.ge.s32.totalorder %v251_v23, 0  ;;  %s546_s21 = sshll.u32 %s762_s12, 6  ;;  %s410_s20 = sshll.u32 %s956_s30, 4  ;;  %s993_s20 = int_to_ptr.vmem [resolvable:$true] %s410_s20 }
  0x5b   : > { %v266_v5 = vsel %vm258_vm0, %v256_v2, -inf  ;;  %vm253_vm4 = vcmp.lt.s32.totalorder %v251_v23, 4  ;;  %s991_s28 = scalar_lea.hbm %s1043_s2, %s546_s21  ;;  %s394_s25 = scalar_lea.sflag [#allocation4], %s941_s15 }
  0x5c   : > { %v261_v6 = vmax.f32 %v259_v3, %v260_v4  ;;  %v267_v7 = vrot.slane %v266_v5, 4  ;;  %v965_v22 = vsub.s32 0, %v962_v19  ;;  %v968_v24 = vsub.s32 1, %v962_v19  ;;  %vm254_vm5 = vmand %vm252_vm3, %vm253_vm4  ;;  %s684_s3 = scalar_lea.vmem %s993_s20, 64  ;;  %p1056_p0 = scmp.ne.s32.totalorder %s1048_s22, 0 }
  0x5d   : > { %v338_v3 = vunpack.c.0.s8 %v337_v58  ;;  %p685_p8 = scmp.ne.s32.totalorder %s993_s20, %s684_s3  ;;  %s777_s12 = smov [#allocation7]  }
  0x5e   : > { %v262_v8 = vrot.slane %v261_v6, 2  ;;  %v268_v9 = vmax.f32 %v266_v5, %v267_v7  ;;  %v308_v25 = vrot.slane %v251_v23, %v965_v22  ;;  %v312_v26 = vrot.slane %v251_v23, %v968_v24  ;;  %s688_s7 = sshll.u32 %s777_s12, 4  ;;  %s689_s7 = int_to_ptr.vmem [resolvable:$false] %s688_s7 }
  0x5f   : > { %v341_v7 = vsub.s32 %v338_v3, %v962_v19  ;;  %p686_p7 = pnand %p685_p8, %p1056_p0  ;;  %s690_s8 = scalar_lea.vmem %s689_s7, 128 }
  0x60   : > { %v263_v10 = vmax.f32 %v261_v6, %v262_v8  ;;  %v269_v11 = vrot.slane %v268_v9, 2  ;;  %vm313_vm1 = vcmp.eq.s32.totalorder %v962_v19, %v308_v25  ;;  %vm314_vm2 = vcmp.eq.s32.totalorder %v962_v19, %v312_v26  ;;  %p691_p10 = scmp.lt.s32.totalorder %s993_s20, %s689_s7  ;;  %p692_p12 = scmp.lt.s32.totalorder %s690_s8, %s684_s3 }
  0x61   : > { %v315_v27 = vsel %vm313_vm1, %v250_v1, 0.0  ;;  %v316_v31 = vsel %vm314_vm2, %v256_v2, 0.0  ;;  %v354_v26 = vld [vmem:[%s956_s30] sm:$0xf]  ;;  %p687_p4 = pneg %p686_p7 }
  0x62   : > { %v264_v12 = vrot.slane %v263_v10, 1  ;;  %v270_v13 = vmax.f32 %v268_v9, %v269_v11  ;;  %v317_v33 = vsel %vm258_vm0, %v315_v27, 0.0  ;;  %v324_v37 = vsel %vm258_vm0, %v316_v31, 0.0  ;;  %p693_p1 = por %p692_p12, %p691_p10 }
  0x63   : > { %v318_v38 = vrot.slane %v317_v33, 4  ;;  %v325_v41 = vrot.slane %v324_v37, 4  ;;  %v776_v9 = vmov 1983009808  }
  0x64   : > { %v265_v14 = vmax.f32 %v263_v10, %v264_v12  ;;  %v271_v15 = vrot.slane %v270_v13, 1  ;;  %v384_v10 = vunpack.c.l.s4 %v776_v9  ;;  %v538_v12 = vsel %vm254_vm5, 1.0, %v774_v0  ;;  %p694_p2 = pnand %p693_p1, %p687_p4 }
  0x65   : > { %v319_v44 = vadd.f32 %v318_v38, %v317_v33  ;;  %v326_v47 = vadd.f32 %v325_v41, %v324_v37  ;;  %v374_v16 = vrot.slane %v538_v12, %v968_v24 }
  0x66   : > { %v272_v17 = vmax.f32 %v270_v13, %v271_v15  ;;  %v370_v15 = vrot.slane %v538_v12, %v965_v22 }
  0x67   : > { %v320_v50 = vrot.slane %v319_v44, 2  ;;  %v327_v52 = vrot.slane %v326_v47, 2 }
  0x68   : > { %v275_v18 = vcombine.low %v265_v14, %v272_v17 }
  0x69   : > { %v321_v53 = vadd.f32 %v320_v50, %v319_v44  ;;  %v328_v54 = vadd.f32 %v327_v52, %v326_v47 }
  0x6a   : > { %v277_v20 = vsub.f32 %v250_v1, %v275_v18 }
  0x6b   : > { %v322_v55 = vrot.slane %v321_v53, 1  ;;  %v329_v56 = vrot.slane %v328_v54, 1 }
  0x6c   : > { %v278_v21 = vmul.f32 1.442695, %v277_v20 }
  0x6d   : > { %v323_v61 = vadd.f32 %v322_v55, %v321_v53  ;;  %v330_v2 = vadd.f32 %v329_v56, %v328_v54 }
  0x6e   : > { %618 = vpow2.f32 %v278_v21 }
  0x78   : > { %v619_v28 = vpop.eup %618 }
  0x79   : > { %v281_v29 = vcombine.high %v619_v28, %v619_v28  ;;  %v283_v30 = vsel %vm258_vm0, %v619_v28, 0.0 }
  0x7a   : > { %v284_v32 = vrot.slane %v283_v30, 4 }
  0x7b   : > { %v290_v34 = vsel %vm258_vm0, %v281_v29, 0.0 }
  0x7c   : > { %v285_v35 = vadd.f32 %v284_v32, %v283_v30  ;;  %v291_v36 = vrot.slane %v290_v34, 4 }
  0x7e   : > { %v286_v39 = vrot.slane %v285_v35, 2  ;;  %v292_v40 = vadd.f32 %v291_v36, %v290_v34 }
  0x80   : > { %v287_v42 = vadd.f32 %v286_v39, %v285_v35  ;;  %v293_v43 = vrot.slane %v292_v40, 2 }
  0x82   : > { %v288_v45 = vrot.slane %v287_v42, 1  ;;  %v294_v46 = vadd.f32 %v293_v43, %v292_v40 }
  0x84   : > { %v289_v48 = vadd.f32 %v288_v45, %v287_v42  ;;  %v295_v49 = vrot.slane %v294_v46, 1 }
  0x86   : > { %v296_v51 = vadd.f32 %v295_v49, %v294_v46  ;;  %620 = vlog2.f32 %v289_v48 }
  0x88   : > { %622 = vlog2.f32 %v296_v51 }
  0x90   : > { %v621_v59 = vpop.eup %620 }
  0x91   : > { %v298_v60 = vmul.f32 0.6931472, %v621_v59 }
  0x92   : > { %v623_v62 = vpop.eup %622 }
  0x93   : > { %v300_v63 = vmul.f32 0.6931472, %v623_v62  ;;  %v301_v1 = vadd.f32 %v298_v60, %v265_v14  ;;  %v385_v14 = vunpack.c.0.s8 %v384_v10 }
  0x95   : > { %v302_v4 = vadd.f32 %v300_v63, %v272_v17  ;;  %v331_v5 = vsub.f32 %v301_v1, %v323_v61  ;;  %v388_v21 = vsub.s32 %v385_v14, %v962_v19 }
  0x97   : > { %v332_v6 = vsub.f32 %v302_v4, %v330_v2 }
  0x99   : > { %v335_v8 = vcombine.low %v331_v5, %v332_v6 }
  0x9b   : > { %v342_v11 = vrot.slane %v335_v8, %v341_v7 }
  0x9d   : > { %v349_v13 = vrot.slane %v342_v11, %v341_v7 }
  0x9f   : > { %v351_v17 = vsel %vm254_vm5, %v349_v13, 0.0 }
  0xa0   : > { %v359_v18 = vrot.slane %v351_v17, %v965_v22  ;;  %v363_v20 = vrot.slane %v351_v17, %v968_v24 }
  0xa2   : > { %v378_v23 = vsel %vm377_vm6, %v359_v18, %v370_v15  ;;  %v379_v25 = vsel %vm377_vm6, %v363_v20, %v374_v16 }
  0xa3   : > { %v382_v0 = vcombine.low %v378_v23, %v379_v25 }
  0xa5   : > { %v389_v27 = vrot.slane %v382_v0, %v388_v21 }
  0xa7   : > { %v391_v28 = vadd.f32 %v389_v27, %v354_v26 }
  0xa9   : > { %392 = vst [vmem:[%s956_s30] sm:$0xf] %v391_v28 }
  0xaa   : > { %697 = shalt.err (!%p694_p2)
}
  0xab   : > { %s698_s15 = scalar_lea.hbm %s991_s28, 64  ;;  %s702_s6 = scalar_lea.hbm %s1043_s2, 128 }
  0xac   : > { %p699_p9 = scmp.ne.s32.totalorder %s991_s28, %s698_s15  ;;  %p703_p6 = scmp.lt.u32.totalorder %s991_s28, %s1043_s2 }
  0xad   : > { %p704_p13 = scmp.lt.u32.totalorder %s702_s6, %s698_s15  ;;  %p706_p8 = scmp.lt.u32.totalorder %s698_s15, %s991_s28 }
  0xae   : > { %p700_p11 = pnand %p699_p9, %p1056_p0 }
  0xaf   : > { %p705_p5 = por %p704_p13, %p703_p6 }
  0xb0   : > { %p701_p3 = pneg %p700_p11 }
  0xb1   : > { %p707_p7 = por %p706_p8, %p705_p5 }
  0xb3   : > { %p708_p4 = pnand %p707_p7, %p701_p3 }
  0xb5   : > { %711 = shalt.err (!%p708_p4)
}
  0xb6   : > { %551 = dma.vmem_to_hbm [thread:$0]  (%p1056_p0), %s993_s20, 64, %s991_s28, %s394_s25  }
  0xb7 PF: > { %s422_s16 = sand.u32 1, %s750_s9   ;;  %p1057_p10 = scmp.ne.s32.totalorder %s1049_s24, 0 }
  0xb8   : > { %p1058_p12 = scmp.ge.s32.totalorder %s770_s14, 2  ;;  %s423_s19 = scalar_lea.sflag [#allocation4], %s422_s16 }
  0xba   : > { %p561_p1 = pnand %p1058_p12, %p1057_p10 }
  0xbc   : > { %745 = dma.done.wait (!%p561_p1), %s423_s19, 64  }
  0xbd   : > { %747 = vsyncadd (!%p561_p1), %s423_s19, 4294967232  ;;  %s21_s14 = sadd.s32 1, %s770_s14   ;;  %s1059_s9 = smov %s754_s10 }
  0xbe   : > { %p18_p2 = scmp.ge.s32.totalorder %s21_s14, 4   ;;  %s1060_s10 = smov %s758_s11 }
  0xbf   : > { %s1061_s11 = smov %s849_s23  ;;  %s1062_s12 = smov %s766_s13 }
  0xc0   : > { %s1063_s13 = smov %s1065_s17  ;;  %20 = sbr.rel (!%p18_p2) target bundleno = 8 (0x8), region = 90 }
  0xc7   :  { %428 = vsyncpa [#allocation3], 1 }
  0xc8   :  { %430 = vsyncpa [#allocation3 + $0x1], 1 }
  0xc9   :  { %431 = vsyncpa [#allocation6], 1 }
  0xca   :  { %433 = vsyncpa [#allocation6 + $0x1], 1 }
  0xcb   :  { %434 = vsyncpa [#allocation4], 1 }
  0xcc   :  { %436 = vsyncpa [#allocation4 + $0x1], 1 }

</bundles_post_ra>
